<compile_context>
chip_gen: v5e
topology: v5e:2x2
jax: 0.10.0
libtpu: 0.0.40
codegen_flags: <defaults>
</compile_context>

<pallas_src>
import functools

import jax
import jax.numpy as jnp
from jax.experimental import pallas as pl
from jax.experimental.pallas import tpu as pltpu


def _fused_decoder_kernel(lap_ref, lp_ref, xc_ref, cd_ref, w1_ref, w2_ref, fold_ref,
                          g1_ref, be1_ref, g2_ref, be2_ref, out_ref,
                          *, unpool, K, eps):
    """Fused: unpool -> ChebConv+BN+ReLU -> (implicit channel concat) -> ChebConv+BN+ReLU.

    Everything lives in the [rows = vertices, lanes = (batch, feature)] layout.
      lap_ref : [V, V]            bf16   rescaled Laplacian
      lp_ref  : [V, Vc]           bf16   lap @ unpool-matrix (folds the unpool into T_1 of conv1)
      xc_ref  : [Vc, B*Cin]       f32    coarse input, columns ordered (b, f)
      cd_ref  : [V,  B*Cin]       f32    encoder skip tensor, columns (b, f)
      w1_ref  : [K*B*Cin, B*Cout] bf16   block-diagonal (over batch) Chebyshev weight, conv1
      w2_ref  : [K*B*(Cout+Cin), B*Cout] bf16  block-diagonal weight, conv2 (x-part rows first)
      fold_ref: [B*Cout, B*Cout]  f32    averages the B batch replicas of each channel
      g*/be*  : [1, B*Cout]       f32    BN gamma/beta, pre-tiled per batch replica
      out_ref : [V, B*Cout]       f32    lane-dense output slab, columns (b, o)
    """
    Vc, BCin = xc_ref.shape
    V = Vc * unpool

    lap = lap_ref[...]                                   # bf16, used directly on the MXU [R1]
    fold = fold_ref[...]

    def cheb_feat(t0, t1=None):
        """Chebyshev features: lane-concat of T_0..T_{K-1}, each [V, W] -> [V, K*W].

        Carries are kept in f32 (f32 MXU accumulation); only the MXU operands are bf16.
        """
        terms = [t0]
        if K > 1:
            if t1 is None:
                t1 = jnp.dot(lap, t0.astype(lap.dtype), preferred_element_type=jnp.float32)
            terms.append(t1)
            for _ in range(2, K):                        # T_k = 2 L T_{k-1} - T_{k-2}
                terms.append(2.0 * jnp.dot(lap, terms[-1].astype(lap.dtype),
                                           preferred_element_type=jnp.float32)
                             - terms[-2])
        return jnp.concatenate(terms, axis=1)            # [V, K*W], columns (k, b, f)

    def bn_relu(y, gamma, beta):
        # BatchNorm1d (training mode): biased stats over (batch, vertices) per channel.
        # `fold` averages the B batch replicas of each channel and broadcasts the result back to
        # every (b, c) column, so no layout shuffle is needed. [R3]
        mean = jnp.mean(jnp.dot(y, fold, preferred_element_type=jnp.float32),
                        axis=0, keepdims=True)
        d = y - mean
        var = jnp.mean(jnp.dot(d * d, fold, preferred_element_type=jnp.float32),
                       axis=0, keepdims=True)
        return jnp.maximum(d * jax.lax.rsqrt(var + eps) * gamma + beta, 0.0)

    # ---- SphericalChebBNPool: nearest unpool (x4 on vertices) + ChebConv + BN + ReLU ----------
    xc = xc_ref[...]                                                        # [Vc, B*Cin]
    t0 = jnp.broadcast_to(xc[:, None, :], (Vc, unpool, BCin)).reshape(V, BCin)
    t1 = None
    if K > 1:                                                               # unpool folded: [R7]
        t1 = jnp.dot(lp_ref[...], xc.astype(lp_ref.dtype),
                     preferred_element_type=jnp.float32)                    # [V, B*Cin]
    feat1 = cheb_feat(t0, t1)                                               # [V, K*B*Cin]
    w1 = w1_ref[...]
    y1 = jnp.dot(feat1.astype(w1.dtype), w1, preferred_element_type=jnp.float32)
    # Conv bias omitted: a per-channel constant is exactly cancelled by batch-stats BN. [R5]
    x1 = bn_relu(y1, g1_ref[...], be1_ref[...])                             # [V, B*Cout]

    # ---- cat([x1, concat_data], channels) + ChebConv + BN + ReLU ------------------------------
    # The channel concat is a lane concat; ONE recurrence covers both parts (wide MXU RHS). [R2]
    z0 = jnp.concatenate([x1, cd_ref[...]], axis=1)                         # [V, B*(Cout+Cin)]
    feat2 = cheb_feat(z0)                                                   # [V, K*B*(Cout+Cin)]
    w2 = w2_ref[...]
    y2 = jnp.dot(feat2.astype(w2.dtype), w2, preferred_element_type=jnp.float32)
    out_ref[...] = bn_relu(y2, g2_ref[...], be2_ref[...]).astype(out_ref.dtype)   # [R4]


def _block_diag_over_batch(w, B):
    """[K, Fin, Fout] -> [K, B*Fin, B*Fout], block-diagonal over the batch within each order."""
    K, Fin, Fout = w.shape
    eye = jnp.eye(B, dtype=w.dtype)
    return jnp.einsum("kfo,bc->kbfco", w, eye).reshape(K, B * Fin, B * Fout)


def spherical_cheb_bn_pool_concat(x, concat_data, lap, params, *,
                                  unpool_factor=4, eps=1e-5):
    """Full SphericalChebBNPoolConcat forward as a single fused Pallas kernel call.

    x           : [B, V/unpool, Cin]   coarse decoder input
    concat_data : [B, V, Cin]          encoder skip tensor
    lap         : [V, V]               rescaled graph Laplacian (dense)
    returns     : [B, V, Cout]
    """
    B, Vc, Cin = x.shape
    V = Vc * unpool_factor
    K, _, Cout = params["w1"].shape
    assert lap.shape == (V, V)
    assert concat_data.shape == (B, V, Cin)

    # ---------------- host-side preparation (plain XLA layout plumbing, done once) -------------
    lap_bf16 = lap.astype(jnp.bfloat16)                                     # [R1]
    # LP = lap @ P, P = nearest-unpool matrix (each coarse vertex -> `unpool_factor` fine rows).
    lp_bf16 = lap.reshape(V, Vc, unpool_factor).sum(axis=2).astype(jnp.bfloat16)   # [R7]

    # Activations in [V, B*F] lane layout (columns ordered (b, f)). [R3]
    xt = jnp.transpose(x, (1, 0, 2)).reshape(Vc, B * Cin)
    cdt = jnp.transpose(concat_data, (1, 0, 2)).reshape(V, B * Cin)

    # Block-diagonal (over batch) Chebyshev weights, flattened k-major. [R1, R3]
    w1bd = _block_diag_over_batch(params["w1"], B).reshape(K * B * Cin, B * Cout)
    w2 = params["w2"]                                                        # [K, Cout+Cin, Cout]
    w2bd = jnp.concatenate(
        [_block_diag_over_batch(w2[:, :Cout, :], B),     # rows for the x-part of the concat
         _block_diag_over_batch(w2[:, Cout:, :], B)],    # rows for concat_data
        axis=1).reshape(K * B * (Cout + Cin), B * Cout)
    w1bd = w1bd.astype(jnp.bfloat16)
    w2bd = w2bd.astype(jnp.bfloat16)

    # BN helpers: channel fold matrix + per-batch-replica tiled gamma/beta.
    ch = jnp.arange(B * Cout) % Cout
    fold = (ch[:, None] == ch[None, :]).astype(jnp.float32) / B
    g1t = jnp.tile(params["g1"].reshape(1, Cout), (1, B))
    be1t = jnp.tile(params["be1"].reshape(1, Cout), (1, B))
    g2t = jnp.tile(params["g2"].reshape(1, Cout), (1, B))
    be2t = jnp.tile(params["be2"].reshape(1, Cout), (1, B))
    # Conv biases b1/b2 are intentionally NOT passed: no-ops through batch-stats BN. [R5]

    operands = (lap_bf16, lp_bf16, xt, cdt, w1bd, w2bd, fold, g1t, be1t, g2t, be2t)

    # Explicit scoped-VMEM budget: operands + f32 Chebyshev features/activations + headroom. [R6]
    in_bytes = sum(int(a.size) * a.dtype.itemsize for a in operands)
    out_bytes = V * B * Cout * 4
    act_bytes = (K + 2) * V * B * (Cin + Cout) * 4
    vmem_limit = int(min(64 << 20, (8 << 20) + 2 * (in_bytes + out_bytes) + 2 * act_bytes))

    kernel = functools.partial(_fused_decoder_kernel, unpool=unpool_factor, K=K, eps=eps)
    vmem = lambda: pl.BlockSpec(memory_space=pltpu.MemorySpace.VMEM)
    out_slab = pl.pallas_call(
        kernel,
        out_shape=jax.ShapeDtypeStruct((V, B * Cout), jnp.float32),          # lane-dense slab [R4]
        in_specs=[vmem() for _ in range(len(operands))],
        out_specs=vmem(),
        compiler_params=pltpu.CompilerParams(vmem_limit_bytes=vmem_limit),
    )(*operands)

    # Restore the module's [batch, vertices, channels] contract (XLA-side layout plumbing). [R4]
    return jnp.transpose(out_slab.reshape(V, B, Cout), (1, 0, 2))


def _reference_forward(x, concat_data, lap, params, *, unpool_factor=4, eps=1e-5):
    """Pure-JAX f32 reference of the PyTorch module's forward (training-mode BN)."""
    hp = jax.lax.Precision.HIGHEST

    def cheb_conv(x, w):
        K = w.shape[0]
        terms = [x]
        if K > 1:
            terms.append(jnp.einsum("uv,bvf->buf", lap, terms[-1], precision=hp))
            for _ in range(2, K):
                terms.append(2.0 * jnp.einsum("uv,bvf->buf", lap, terms[-1], precision=hp)
                             - terms[-2])
        return sum(jnp.einsum("bvf,fo->bvo", terms[k], w[k], precision=hp)
                   for k in range(K))

    def bn_relu(y, b, g, be):
        y = y + b
        m = jnp.mean(y, axis=(0, 1), keepdims=True)
        v = jnp.mean((y - m) ** 2, axis=(0, 1), keepdims=True)
        y = (y - m) * jax.lax.rsqrt(v + eps) * g + be
        return jnp.maximum(y, 0.0)

    x = jnp.repeat(x, unpool_factor, axis=1)
    x = bn_relu(cheb_conv(x, params["w1"]), params["b1"], params["g1"], params["be1"])
    x = jnp.concatenate([x, concat_data], axis=2)
    x = bn_relu(cheb_conv(x, params["w2"]), params["b2"], params["g2"], params["be2"])
    return x


def ring_laplacian(V):
    """Deterministic dense rescaled Laplacian of a ring graph (stand-in for the sphere graph)."""
    idx = jnp.arange(V)
    A = jnp.zeros((V, V), jnp.float32)
    A = A.at[idx, (idx + 1) % V].set(1.0)
    A = A.at[idx, (idx - 1) % V].set(1.0)
    L = jnp.diag(A.sum(axis=1)) - A
    return (2.0 / 4.0) * L - jnp.eye(V, dtype=jnp.float32)      # lmax of a ring Laplacian is 4


if __name__ == "__main__":
    B = 2
    V_coarse = 16
    UNPOOL = 4
    V = V_coarse * UNPOOL          # 64 vertices after unpooling
    Cin, Cout, K = 4, 8, 3         # in_channels, out_channels, kernel_size

    key = jax.random.PRNGKey(0)
    k1, k2, k3, k4 = jax.random.split(key, 4)

    x = jax.random.normal(k1, (B, V_coarse, Cin), jnp.float32)
    concat_data = jax.random.normal(k2, (B, V, Cin), jnp.float32)
    lap = ring_laplacian(V)

    std1 = (2.0 / (Cin * K)) ** 0.5
    std2 = (2.0 / ((Cin + Cout) * K)) ** 0.5
    params = dict(
        w1=std1 * jax.random.normal(k3, (K, Cin, Cout), jnp.float32),
        b1=jnp.full((1, Cout), 0.01, jnp.float32),
        g1=jnp.ones((1, Cout), jnp.float32),
        be1=jnp.zeros((1, Cout), jnp.float32),
        w2=std2 * jax.random.normal(k4, (K, Cin + Cout, Cout), jnp.float32),
        b2=jnp.full((1, Cout), 0.01, jnp.float32),
        g2=jnp.ones((1, Cout), jnp.float32),
        be2=jnp.zeros((1, Cout), jnp.float32),
    )

    out = spherical_cheb_bn_pool_concat(x, concat_data, lap, params,
                                        unpool_factor=UNPOOL)
    out = jax.block_until_ready(out)
    assert out.shape == (B, V, Cout), out.shape
    assert out.dtype == jnp.float32
    assert bool(jnp.isfinite(out).all())

    # Structural-correctness check vs. a pure-JAX f32 reference. The kernel uses bf16 MXU
    # operands (f32 accumulation), so small (~1e-2) numerical differences are expected; a
    # layout / block-diagonal-weight / fold-matrix bug would show up as O(1) mismatches.
    ref = jax.block_until_ready(
        _reference_forward(x, concat_data, lap, params, unpool_factor=UNPOOL))
    max_err = float(jnp.max(jnp.abs(out - ref)))
    assert max_err < 0.2, f"max abs diff vs reference too large: {max_err}"

    print("KERNEL_OK")
</pallas_src>

<mosaic_0001>
module attributes {stable_mosaic.version = 11 : i64} {
  func.func @_fused_decoder_kernel(%arg0: memref<64x64xbf16, #tpu.memory_space<vmem>>, %arg1: memref<64x16xbf16, #tpu.memory_space<vmem>>, %arg2: memref<16x8xf32, #tpu.memory_space<vmem>>, %arg3: memref<64x8xf32, #tpu.memory_space<vmem>>, %arg4: memref<24x16xbf16, #tpu.memory_space<vmem>>, %arg5: memref<72x16xbf16, #tpu.memory_space<vmem>>, %arg6: memref<16x16xf32, #tpu.memory_space<vmem>>, %arg7: memref<1x16xf32, #tpu.memory_space<vmem>>, %arg8: memref<1x16xf32, #tpu.memory_space<vmem>>, %arg9: memref<1x16xf32, #tpu.memory_space<vmem>>, %arg10: memref<1x16xf32, #tpu.memory_space<vmem>>, %arg11: memref<64x16xf32, #tpu.memory_space<vmem>>) attributes {dimension_semantics = [], scalar_prefetch = 0 : i64, scratch_operands = 0 : i64, tpu.core_type = #tpu.core_type<tc>} {
    %c0 = arith.constant 0 : index
    %c0_0 = arith.constant 0 : index
    %0 = vector.load %arg0[%c0, %c0_0] : memref<64x64xbf16, #tpu.memory_space<vmem>>, vector<64x64xbf16>
    %c0_1 = arith.constant 0 : index
    %c0_2 = arith.constant 0 : index
    %1 = vector.load %arg6[%c0_1, %c0_2] : memref<16x16xf32, #tpu.memory_space<vmem>>, vector<16x16xf32>
    %c0_3 = arith.constant 0 : index
    %c0_4 = arith.constant 0 : index
    %2 = vector.load %arg2[%c0_3, %c0_4] : memref<16x8xf32, #tpu.memory_space<vmem>>, vector<16x8xf32>
    %3 = vector.shape_cast %2 : vector<16x8xf32> to vector<16x1x8xf32>
    %4 = vector.shape_cast %3 : vector<16x1x8xf32> to vector<16x1x8xf32>
    %5 = vector.broadcast %4 : vector<16x1x8xf32> to vector<16x4x8xf32>
    %6 = vector.shape_cast %5 : vector<16x4x8xf32> to vector<64x8xf32>
    %c0_5 = arith.constant 0 : index
    %c0_6 = arith.constant 0 : index
    %7 = vector.load %arg1[%c0_5, %c0_6] : memref<64x16xbf16, #tpu.memory_space<vmem>>, vector<64x16xbf16>
    %8 = arith.truncf %2 : vector<16x8xf32> to vector<16x8xbf16>
    %cst = arith.constant dense<0.000000e+00> : vector<64x8xf32>
    %9 = tpu.matmul %7, %8, %cst {dimension_numbers = #tpu.dot_dimension_numbers<[1], [0], [0], [1], [0, 0, 1, 1], [], []>} : vector<64x16xbf16>, vector<16x8xbf16>, vector<64x8xf32> -> vector<64x8xf32>
    %10 = arith.truncf %9 : vector<64x8xf32> to vector<64x8xbf16>
    %cst_7 = arith.constant dense<0.000000e+00> : vector<64x8xf32>
    %11 = tpu.matmul %0, %10, %cst_7 {dimension_numbers = #tpu.dot_dimension_numbers<[1], [0], [0], [1], [0, 0, 1, 1], [], []>} : vector<64x64xbf16>, vector<64x8xbf16>, vector<64x8xf32> -> vector<64x8xf32>
    %cst_8 = arith.constant 2.000000e+00 : f32
    %12 = vector.broadcast %cst_8 : f32 to vector<64x8xf32>
    %13 = arith.mulf %12, %11 : vector<64x8xf32>
    %14 = arith.subf %13, %6 : vector<64x8xf32>
    %15 = tpu.concatenate %6, %9, %14 in 1 : vector<64x8xf32>, vector<64x8xf32>, vector<64x8xf32> -> vector<64x24xf32>
    %c0_9 = arith.constant 0 : index
    %c0_10 = arith.constant 0 : index
    %16 = vector.load %arg4[%c0_9, %c0_10] : memref<24x16xbf16, #tpu.memory_space<vmem>>, vector<24x16xbf16>
    %17 = arith.truncf %15 : vector<64x24xf32> to vector<64x24xbf16>
    %cst_11 = arith.constant dense<0.000000e+00> : vector<64x16xf32>
    %18 = tpu.matmul %17, %16, %cst_11 {dimension_numbers = #tpu.dot_dimension_numbers<[1], [0], [0], [1], [0, 0, 1, 1], [], []>} : vector<64x24xbf16>, vector<24x16xbf16>, vector<64x16xf32> -> vector<64x16xf32>
    %c0_12 = arith.constant 0 : index
    %c0_13 = arith.constant 0 : index
    %19 = vector.load %arg7[%c0_12, %c0_13] : memref<1x16xf32, #tpu.memory_space<vmem>>, vector<1x16xf32>
    %c0_14 = arith.constant 0 : index
    %c0_15 = arith.constant 0 : index
    %20 = vector.load %arg8[%c0_14, %c0_15] : memref<1x16xf32, #tpu.memory_space<vmem>>, vector<1x16xf32>
    %cst_16 = arith.constant dense<0.000000e+00> : vector<64x16xf32>
    %21 = tpu.matmul %18, %1, %cst_16 {dimension_numbers = #tpu.dot_dimension_numbers<[1], [0], [0], [1], [0, 0, 1, 1], [], []>} : vector<64x16xf32>, vector<16x16xf32>, vector<64x16xf32> -> vector<64x16xf32>
    %cst_17 = arith.constant dense<0.000000e+00> : vector<16xf32>
    %22 = vector.multi_reduction <add>, %21, %cst_17 [0] : vector<64x16xf32> to vector<16xf32>
    %23 = vector.shape_cast %22 : vector<16xf32> to vector<1x16xf32>
    %cst_18 = arith.constant 6.400000e+01 : f32
    %24 = vector.broadcast %cst_18 : f32 to vector<1x16xf32>
    %25 = arith.divf %23, %24 : vector<1x16xf32>
    %26 = vector.broadcast %25 : vector<1x16xf32> to vector<64x16xf32>
    %27 = arith.subf %18, %26 : vector<64x16xf32>
    %28 = arith.mulf %27, %27 : vector<64x16xf32>
    %cst_19 = arith.constant dense<0.000000e+00> : vector<64x16xf32>
    %29 = tpu.matmul %28, %1, %cst_19 {dimension_numbers = #tpu.dot_dimension_numbers<[1], [0], [0], [1], [0, 0, 1, 1], [], []>} : vector<64x16xf32>, vector<16x16xf32>, vector<64x16xf32> -> vector<64x16xf32>
    %cst_20 = arith.constant dense<0.000000e+00> : vector<16xf32>
    %30 = vector.multi_reduction <add>, %29, %cst_20 [0] : vector<64x16xf32> to vector<16xf32>
    %31 = vector.shape_cast %30 : vector<16xf32> to vector<1x16xf32>
    %cst_21 = arith.constant 6.400000e+01 : f32
    %32 = vector.broadcast %cst_21 : f32 to vector<1x16xf32>
    %33 = arith.divf %31, %32 : vector<1x16xf32>
    %cst_22 = arith.constant 9.99999974E-6 : f32
    %34 = vector.broadcast %cst_22 : f32 to vector<1x16xf32>
    %35 = arith.addf %33, %34 : vector<1x16xf32>
    %36 = math.rsqrt %35 : vector<1x16xf32>
    %37 = vector.broadcast %36 : vector<1x16xf32> to vector<64x16xf32>
    %38 = arith.mulf %27, %37 : vector<64x16xf32>
    %39 = vector.broadcast %19 : vector<1x16xf32> to vector<64x16xf32>
    %40 = arith.mulf %38, %39 : vector<64x16xf32>
    %41 = vector.broadcast %20 : vector<1x16xf32> to vector<64x16xf32>
    %42 = arith.addf %40, %41 : vector<64x16xf32>
    %cst_23 = arith.constant 0.000000e+00 : f32
    %43 = vector.broadcast %cst_23 : f32 to vector<64x16xf32>
    %44 = arith.maximumf %42, %43 : vector<64x16xf32>
    %c0_24 = arith.constant 0 : index
    %c0_25 = arith.constant 0 : index
    %45 = vector.load %arg3[%c0_24, %c0_25] : memref<64x8xf32, #tpu.memory_space<vmem>>, vector<64x8xf32>
    %46 = tpu.concatenate %44, %45 in 1 : vector<64x16xf32>, vector<64x8xf32> -> vector<64x24xf32>
    %47 = arith.truncf %46 : vector<64x24xf32> to vector<64x24xbf16>
    %cst_26 = arith.constant dense<0.000000e+00> : vector<64x24xf32>
    %48 = tpu.matmul %0, %47, %cst_26 {dimension_numbers = #tpu.dot_dimension_numbers<[1], [0], [0], [1], [0, 0, 1, 1], [], []>} : vector<64x64xbf16>, vector<64x24xbf16>, vector<64x24xf32> -> vector<64x24xf32>
    %49 = arith.truncf %48 : vector<64x24xf32> to vector<64x24xbf16>
    %cst_27 = arith.constant dense<0.000000e+00> : vector<64x24xf32>
    %50 = tpu.matmul %0, %49, %cst_27 {dimension_numbers = #tpu.dot_dimension_numbers<[1], [0], [0], [1], [0, 0, 1, 1], [], []>} : vector<64x64xbf16>, vector<64x24xbf16>, vector<64x24xf32> -> vector<64x24xf32>
    %cst_28 = arith.constant 2.000000e+00 : f32
    %51 = vector.broadcast %cst_28 : f32 to vector<64x24xf32>
    %52 = arith.mulf %51, %50 : vector<64x24xf32>
    %53 = arith.subf %52, %46 : vector<64x24xf32>
    %54 = tpu.concatenate %46, %48, %53 in 1 : vector<64x24xf32>, vector<64x24xf32>, vector<64x24xf32> -> vector<64x72xf32>
    %c0_29 = arith.constant 0 : index
    %c0_30 = arith.constant 0 : index
    %55 = vector.load %arg5[%c0_29, %c0_30] : memref<72x16xbf16, #tpu.memory_space<vmem>>, vector<72x16xbf16>
    %56 = arith.truncf %54 : vector<64x72xf32> to vector<64x72xbf16>
    %cst_31 = arith.constant dense<0.000000e+00> : vector<64x16xf32>
    %57 = tpu.matmul %56, %55, %cst_31 {dimension_numbers = #tpu.dot_dimension_numbers<[1], [0], [0], [1], [0, 0, 1, 1], [], []>} : vector<64x72xbf16>, vector<72x16xbf16>, vector<64x16xf32> -> vector<64x16xf32>
    %c0_32 = arith.constant 0 : index
    %c0_33 = arith.constant 0 : index
    %58 = vector.load %arg9[%c0_32, %c0_33] : memref<1x16xf32, #tpu.memory_space<vmem>>, vector<1x16xf32>
    %c0_34 = arith.constant 0 : index
    %c0_35 = arith.constant 0 : index
    %59 = vector.load %arg10[%c0_34, %c0_35] : memref<1x16xf32, #tpu.memory_space<vmem>>, vector<1x16xf32>
    %cst_36 = arith.constant dense<0.000000e+00> : vector<64x16xf32>
    %60 = tpu.matmul %57, %1, %cst_36 {dimension_numbers = #tpu.dot_dimension_numbers<[1], [0], [0], [1], [0, 0, 1, 1], [], []>} : vector<64x16xf32>, vector<16x16xf32>, vector<64x16xf32> -> vector<64x16xf32>
    %cst_37 = arith.constant dense<0.000000e+00> : vector<16xf32>
    %61 = vector.multi_reduction <add>, %60, %cst_37 [0] : vector<64x16xf32> to vector<16xf32>
    %62 = vector.shape_cast %61 : vector<16xf32> to vector<1x16xf32>
    %cst_38 = arith.constant 6.400000e+01 : f32
    %63 = vector.broadcast %cst_38 : f32 to vector<1x16xf32>
    %64 = arith.divf %62, %63 : vector<1x16xf32>
    %65 = vector.broadcast %64 : vector<1x16xf32> to vector<64x16xf32>
    %66 = arith.subf %57, %65 : vector<64x16xf32>
    %67 = arith.mulf %66, %66 : vector<64x16xf32>
    %cst_39 = arith.constant dense<0.000000e+00> : vector<64x16xf32>
    %68 = tpu.matmul %67, %1, %cst_39 {dimension_numbers = #tpu.dot_dimension_numbers<[1], [0], [0], [1], [0, 0, 1, 1], [], []>} : vector<64x16xf32>, vector<16x16xf32>, vector<64x16xf32> -> vector<64x16xf32>
    %cst_40 = arith.constant dense<0.000000e+00> : vector<16xf32>
    %69 = vector.multi_reduction <add>, %68, %cst_40 [0] : vector<64x16xf32> to vector<16xf32>
    %70 = vector.shape_cast %69 : vector<16xf32> to vector<1x16xf32>
    %cst_41 = arith.constant 6.400000e+01 : f32
    %71 = vector.broadcast %cst_41 : f32 to vector<1x16xf32>
    %72 = arith.divf %70, %71 : vector<1x16xf32>
    %cst_42 = arith.constant 9.99999974E-6 : f32
    %73 = vector.broadcast %cst_42 : f32 to vector<1x16xf32>
    %74 = arith.addf %72, %73 : vector<1x16xf32>
    %75 = math.rsqrt %74 : vector<1x16xf32>
    %76 = vector.broadcast %75 : vector<1x16xf32> to vector<64x16xf32>
    %77 = arith.mulf %66, %76 : vector<64x16xf32>
    %78 = vector.broadcast %58 : vector<1x16xf32> to vector<64x16xf32>
    %79 = arith.mulf %77, %78 : vector<64x16xf32>
    %80 = vector.broadcast %59 : vector<1x16xf32> to vector<64x16xf32>
    %81 = arith.addf %79, %80 : vector<64x16xf32>
    %cst_43 = arith.constant 0.000000e+00 : f32
    %82 = vector.broadcast %cst_43 : f32 to vector<64x16xf32>
    %83 = arith.maximumf %81, %82 : vector<64x16xf32>
    %c0_44 = arith.constant 0 : index
    %c0_45 = arith.constant 0 : index
    %84 = vector.load %arg11[%c0_44, %c0_45] : memref<64x16xf32, #tpu.memory_space<vmem>>, vector<64x16xf32>
    tpu.vector_store %arg11[%c0_44, %c0_45], %83 {strides = array<i32>} : memref<64x16xf32, #tpu.memory_space<vmem>>, vector<64x16xf32>,
    return
  }
}

</mosaic_0001>

<bundles_post_ra>
// kernel: tpu_custom_call.1
= control target key start
LH: loop header
LB: loop body
LE: loop exit
PB: predicated region body
PF: predicated region fallthrough
CT: control target
= control target key end

     0   :  { %vm112_vm0 = vcmask 130048   ;;  %s1474_s28 = smov 8   ;;  %vm178_vm1 = vcmask 523264   ;;  %s1475_s17 = smov 16   ;;  %vm424_vm2 = vcmask 1043456   ;;  %vm378_vm3 = vcmask 64512   ;;  %s2024_s2 = inlined_call_operand.vmem [shape: f32[16,8], index: 2, kind: input, shape index: {}]   ;;  %s2025_s1 = inlined_call_operand.vmem [shape: bf16[64,16], index: 1, kind: input, shape index: {}]   ;;  %s2026_s0 = inlined_call_operand.vmem [shape: bf16[64,64], index: 0, kind: input, shape index: {}]   ;;  %s2027_s4 = inlined_call_operand.vmem [shape: bf16[24,16], index: 4, kind: input, shape index: {}]   ;;  %s2028_s6 = inlined_call_operand.vmem [shape: f32[16,16], index: 6, kind: input, shape index: {}]   ;;  %s2029_s5 = inlined_call_operand.vmem [shape: bf16[72,16], index: 5, kind: input, shape index: {}]   ;;  %s2030_s3 = inlined_call_operand.vmem [shape: f32[64,8], index: 3, kind: input, shape index: {}]   ;;  %s2031_s7 = inlined_call_operand.vmem [shape: f32[1,16], index: 7, kind: input, shape index: {}]   ;;  %s2032_s8 = inlined_call_operand.vmem [shape: f32[1,16], index: 8, kind: input, shape index: {}]   ;;  %s2033_s9 = inlined_call_operand.vmem [shape: f32[1,16], index: 9, kind: input, shape index: {}]   ;;  %s2034_s10 = inlined_call_operand.vmem [shape: f32[1,16], index: 10, kind: input, shape index: {}]   ;;  %s2035_s11 = inlined_call_operand.vmem [shape: f32[64,16], index: 11, kind: output, shape index: {}]  }
   0x1   :  { %v1542_v0 = vld [vmem:[%s2024_s2] sm:$0xff]  ;;  %v1547_v1 = vld [vmem:[%s2024_s2 + $0x8] sm:$0xff]  ;;  %v1368_v5 = vld [vmem:[%s2025_s1 + $0x10] sm:$0xff]  ;;  %vm411_vm4 = vcmask 195584   ;;  %vm907_vm9 = vcmask 392192   ;;  %vm956_vm10 = vcmask 588800  }
   0x2   :  { %v91_v2 = vpack.c.bf16 %v1547_v1, %v1542_v0  ;;  %v1366_v3 = vld [vmem:[%s2025_s1] sm:$0xff]  ;;  %v1367_v4 = vld [vmem:[%s2025_s1 + $0x8] sm:$0xff]  ;;  %v1369_v6 = vld [vmem:[%s2025_s1 + $0x18] sm:$0xff]  ;;  %v53_v21 = vrot.slane %v1542_v0, 1  ;;  %v54_v22 = vrot.slane %v1542_v0, 2  ;;  %v55_v23 = vrot.slane %v1542_v0, 3 }
   0x3   :  { %v1582_v25 = vld [vmem:[%s2026_s0] sm:$0xff]  ;;  %v67_v26 = vperm.slane %v1542_v0, 0  ;;  %v60_v30 = vrot.slane %v1547_v1, 1  ;;  %v61_v31 = vrot.slane %v1547_v1, 2  ;;  %v62_v32 = vrot.slane %v1547_v1, 3  ;;  %v1600_v41 = vld [vmem:[%s2026_s0 + $0x8] sm:$0xff] }
   0x4   :  { %132 = vmatpush.bf16.msra.mxu0 %v91_v2  ;;  %v68_v27 = vperm.slane %v53_v21, 0  ;;  %v69_v28 = vperm.slane %v54_v22, 0  ;;  %v70_v29 = vperm.slane %v55_v23, 0  ;;  %v75_v33 = vperm.slane %v1547_v1, 0  ;;  %v1621_v61 = vld [vmem:[%s2026_s0 + $0x10] sm:$0xff]  ;;  %v1630_v2 = vld [vmem:[%s2026_s0 + $0x18] sm:$0xff] }
   0x5   :  { %228 = vst [vmem:[#allocation1] ss:$2 sm:$0xff] %v67_v26  ;;  %v76_v34 = vperm.slane %v60_v30, 0  ;;  %v77_v35 = vperm.slane %v61_v31, 0  ;;  %v78_v36 = vperm.slane %v62_v32, 0  ;;  %v56_v39 = vrot.slane %v1542_v0, 4 }
   0x6   :  { %230 = vst [vmem:[#allocation1 + $0x1] ss:$2 sm:$0xff] %v68_v27  ;;  %v57_v40 = vrot.slane %v1542_v0, 5  ;;  %v58_v42 = vrot.slane %v1542_v0, 6  ;;  %v59_v45 = vrot.slane %v1542_v0, 7  ;;  %v63_v50 = vrot.slane %v1547_v1, 4 }
   0x7   :  { %1270 = vmatmul.msk.bf16.vlgmr.msra.gmra.mxu0 %vm112_vm0, %v1366_v3  ;;  %232 = vst [vmem:[#allocation1 + $0x10] ss:$2 sm:$0xff] %v69_v28  ;;  %v71_v43 = vperm.slane %v56_v39, 0  ;;  %v64_v51 = vrot.slane %v1547_v1, 5  ;;  %v65_v54 = vrot.slane %v1547_v1, 6  ;;  %v66_v55 = vrot.slane %v1547_v1, 7 }
   0x8   :  { %234 = vst [vmem:[#allocation1 + $0x11] ss:$2 sm:$0xff] %v70_v29  ;;  %v72_v44 = vperm.slane %v57_v40, 0  ;;  %v73_v47 = vperm.slane %v58_v42, 0  ;;  %v74_v49 = vperm.slane %v59_v45, 0  ;;  %v79_v52 = vperm.slane %v63_v50, 0 }
   0x9   :  { %236 = vst [vmem:[#allocation1 + $0x20] ss:$2 sm:$0xff] %v71_v43  ;;  %v80_v53 = vperm.slane %v64_v51, 0  ;;  %v81_v58 = vperm.slane %v65_v54, 0  ;;  %v82_v60 = vperm.slane %v66_v55, 0 }
   0xa   :  { %238 = vst [vmem:[#allocation1 + $0x21] ss:$2 sm:$0xff] %v72_v44  ;;  %v397_v21 = vld [vmem:[%s2027_s4 + $0x8] sm:$0xf] }
   0xb   :  { %240 = vst [vmem:[#allocation1 + $0x30] ss:$2 sm:$0xff] %v73_v47  ;;  %v407_v23 = vunpack.c.l.b16 %v397_v21 }
   0xc   :  { %242 = vst [vmem:[#allocation1 + $0x31] ss:$2 sm:$0xff] %v74_v49 }
   0xd   :  { %v1591_v37 = vld.sshfl [vmem:[#allocation1] sm:$0xff pattern:$0x75316420] }
   0xe   :  { %247 = vst [vmem:[#allocation1] ss:$2 sm:$0xff] %v75_v33 }
   0xf   :  { %v1593_v38 = vld.sshfl [vmem:[#allocation1 + $0x10] sm:$0xff pattern:$0x75316420]  ;;  %248 = vst [vmem:[#allocation1 + $0x1] ss:$2 sm:$0xff] %v76_v34 }
  0x10   :  { %249 = vst [vmem:[#allocation1 + $0x10] ss:$2 sm:$0xff] %v77_v35 }
  0x11   :  { %250 = vst [vmem:[#allocation1 + $0x11] ss:$2 sm:$0xff] %v78_v36  ;;  %v245_v56 = vld.sshfl [vmem:[#allocation1 + $0x20] sm:$0xff pattern:$0x75316420] }
  0x12   :  { %251 = vst [vmem:[#allocation1 + $0x20] ss:$2 sm:$0xff] %v79_v52 }
  0x13   :  { %252 = vst [vmem:[#allocation1 + $0x21] ss:$2 sm:$0xff] %v80_v53  ;;  %v246_v62 = vld.sshfl [vmem:[#allocation1 + $0x30] sm:$0xff pattern:$0x75316420] }
  0x14   :  { %253 = vst [vmem:[#allocation1 + $0x30] ss:$2 sm:$0xff] %v81_v58 }
  0x15   :  { %254 = vst [vmem:[#allocation1 + $0x31] ss:$2 sm:$0xff] %v82_v60 }
  0x16   :  { %v1604_v46 = vld.sshfl [vmem:[#allocation1] sm:$0xff pattern:$0x75316420] }
  0x17   :  { %1271 = vmatmul.msk.bf16.gmra.mxu0 %vm112_vm0, %v1367_v4  ;;  %275 = vst [vmem:[#allocation1] ss:$2 sm:$0xff] %v67_v26 }
  0x18   :  { %v1608_v48 = vld.sshfl [vmem:[#allocation1 + $0x10] sm:$0xff pattern:$0x75316420]  ;;  %277 = vst [vmem:[#allocation1 + $0x1] ss:$2 sm:$0xff] %v68_v27 }
  0x19   :  { %279 = vst [vmem:[#allocation1 + $0x10] ss:$2 sm:$0xff] %v69_v28 }
  0x1a   :  { %281 = vst [vmem:[#allocation1 + $0x11] ss:$2 sm:$0xff] %v70_v29  ;;  %v257_v63 = vld.sshfl [vmem:[#allocation1 + $0x20] sm:$0xff pattern:$0x75316420] }
  0x1b   :  { %283 = vst [vmem:[#allocation1 + $0x20] ss:$2 sm:$0xff] %v71_v43 }
  0x1c   :  { %285 = vst [vmem:[#allocation1 + $0x21] ss:$2 sm:$0xff] %v72_v44  ;;  %v258_v0 = vld.sshfl [vmem:[#allocation1 + $0x30] sm:$0xff pattern:$0x75316420] }
  0x1d   :  { %287 = vst [vmem:[#allocation1 + $0x30] ss:$2 sm:$0xff] %v73_v47 }
  0x1e   :  { %289 = vst [vmem:[#allocation1 + $0x31] ss:$2 sm:$0xff] %v74_v49 }
  0x1f   :  { %v1614_v57 = vld.sshfl [vmem:[#allocation1] sm:$0xff pattern:$0x75316420] }
  0x20   :  { %294 = vst [vmem:[#allocation1] ss:$2 sm:$0xff] %v75_v33 }
  0x21   :  { %v1616_v59 = vld.sshfl [vmem:[#allocation1 + $0x10] sm:$0xff pattern:$0x75316420]  ;;  %295 = vst [vmem:[#allocation1 + $0x1] ss:$2 sm:$0xff] %v76_v34 }
  0x22   :  { %296 = vst [vmem:[#allocation1 + $0x10] ss:$2 sm:$0xff] %v77_v35 }
  0x23   :  { %297 = vst [vmem:[#allocation1 + $0x11] ss:$2 sm:$0xff] %v78_v36  ;;  %v1625_v1 = vld.sshfl [vmem:[#allocation1 + $0x20] sm:$0xff pattern:$0x75316420] }
  0x24   :  { %298 = vst [vmem:[#allocation1 + $0x20] ss:$2 sm:$0xff] %v79_v52 }
  0x25   :  { %299 = vst [vmem:[#allocation1 + $0x21] ss:$2 sm:$0xff] %v80_v53  ;;  %v1632_v3 = vld.sshfl [vmem:[#allocation1 + $0x30] sm:$0xff pattern:$0x75316420] }
  0x26   :  { %300 = vst [vmem:[#allocation1 + $0x30] ss:$2 sm:$0xff] %v81_v58 }
  0x27   :  { %1272 = vmatmul.msk.bf16.gmra.mxu0 %vm112_vm0, %v1368_v5  ;;  %301 = vst [vmem:[#allocation1 + $0x31] ss:$2 sm:$0xff] %v82_v60 }
  0x37   :  { %1273 = vmatmul.msk.bf16.gmra.mxu0 %vm112_vm0, %v1369_v6 }
  0x84   :  { %v134_v7 = vpop.f32.mrf.mxu0 }
  0x8c   :  { %v136_v8 = vpop.f32.mrf.mxu0 }
  0x8d   :  { %v1384_v9 = vpack.i.bf16 %v136_v8, %v134_v7  ;;  %v154_v24 = vpack.c.bf16 %v136_v8, %v134_v7 }
  0x8f   :  { %1385 = vrot.lane.b32.xlu0 %v1384_v9, %s1474_s28 }
  0x94   :  { %v139_v10 = vpop.f32.mrf.mxu0 }
  0x9c   :  { %v141_v11 = vpop.f32.mrf.mxu0 }
  0x9d   :  { %v1394_v12 = vpack.i.bf16 %v141_v11, %v139_v10  ;;  %v155_v20 = vpack.c.bf16 %v141_v11, %v139_v10 }
  0x9f   :  { %1395 = vrot.lane.b32.xlu1 %v1394_v12, %s1474_s28 }
  0xa4   :  { %v144_v13 = vpop.f32.mrf.mxu0 }
  0xac   :  { %v146_v14 = vpop.f32.mrf.mxu0 }
  0xad   :  { %v1404_v15 = vpack.i.bf16 %v146_v14, %v144_v13  ;;  %v156_v19 = vpack.c.bf16 %v146_v14, %v144_v13 }
  0xaf   :  { %1405 = vrot.lane.b32.xlu2 %v1404_v15, %s1474_s28 }
  0xb4   :  { %v1570_v16 = vpop.f32.mrf.mxu0 }
  0xbc   :  { %v1572_v17 = vpop.f32.mrf.mxu0 }
  0xbd   :  { %v157_v18 = vpack.c.bf16 %v1572_v17, %v1570_v16  ;;  %v1414_v12 = vpack.i.bf16 %v1572_v17, %v1570_v16 }
  0xbf   :  { %195 = vmatpush.bf16.msra.mxu1 %v157_v18 }
  0xc3   :  { %196 = vmatpush.bf16.msra.mxu1 %v156_v19 }
  0xc7   :  { %197 = vmatpush.bf16.msra.mxu1 %v155_v20 }
  0xcb   :  { %198 = vmatpush.bf16.msra.mxu1 %v154_v24  ;;  %v409_v24 = vpack.c.b16 %v407_v23, %v407_v23 }
  0xcd   :  { %v426_v16 = vsel %vm424_vm2, %v409_v24, 0 }
  0xce   :  { %1290 = vmatmul.msk.bf16.vlgmr.msra.gmra.mxu1 %vm178_vm1, %v1582_v25  ;;  %434 = vmatpush.bf16.msra.mxu2 %v426_v16 }
  0xde   :  { %1291 = vmatmul.msk.bf16.gmra.mxu1 %vm178_vm1, %v1600_v41 }
  0xee   :  { %1292 = vmatmul.msk.bf16.gmra.mxu1 %vm178_vm1, %v1621_v61 }
  0xfe   :  { %1293 = vmatmul.msk.bf16.gmra.mxu1 %vm178_vm1, %v1630_v2 }
 0x101   :  { %v1386_v39 = vpop.permute.xlu0 %1385 }
 0x102   :  { %v1388_v40 = vunpack.i.h.bf16 %v1386_v39  ;;  %v1387_v42 = vunpack.i.l.bf16 %v1386_v39 }
 0x104   :  { %v379_v47 = vsel %vm378_vm3, %v1614_v57, %v1387_v42 }
 0x109   :  { %v1406_v58 = vpop.permute.xlu2 %1405 }
 0x111   :  { %v1396_v51 = vpop.permute.xlu1 %1395 }
 0x112   :  { %v1398_v52 = vunpack.i.h.bf16 %v1396_v51  ;;  %v1397_v53 = vunpack.i.l.bf16 %v1396_v51 }
 0x114   :  { %v381_v57 = vsel %vm378_vm3, %v1625_v1, %v1397_v53 }
 0x14b   :  { %v200_v4 = vpop.f32.mrf.mxu1 }
 0x14c   :  { %v220_v5 = vmul.f32 2.0, %v200_v4  ;;  %v1407_v4 = vunpack.i.l.bf16 %v1406_v58 }
 0x14e   :  { %v267_v8 = vsub.f32 %v220_v5, %v1591_v37  ;;  %v302_v5 = vld.sshfl [vmem:[#allocation1] sm:$0xff pattern:$0x75316420] }
 0x153   :  { %v202_v6 = vpop.f32.mrf.mxu1 }
 0x154   :  { %v221_v7 = vmul.f32 2.0, %v202_v6  ;;  %v303_v6 = vld.sshfl [vmem:[#allocation1 + $0x10] sm:$0xff pattern:$0x75316420] }
 0x156   :  { %v268_v9 = vsub.f32 %v221_v7, %v1593_v38  ;;  %v1370_v38 = vld [vmem:[%s2027_s4] sm:$0xff] }
 0x157   :  { %435 = vmatpush.bf16.msra.mxu2 %v1370_v38 }
 0x158   :  { %v1389_v10 = vpack.i.bf16 %v268_v9, %v267_v8 }
 0x15a   :  { %1390 = vrot.lane.b32.xlu0 %v1389_v10, %s1475_s17  ;;  %v383_v10 = vsel %vm378_vm3, %v302_v5, %v1407_v4 }
 0x15b   :  { %v205_v11 = vpop.f32.mrf.mxu1 }
 0x15c   :  { %v222_v13 = vmul.f32 2.0, %v205_v11 }
 0x15e   :  { %v269_v18 = vsub.f32 %v222_v13, %v245_v56 }
 0x162   :  { %1415 = vrot.lane.b32.xlu0 %v1414_v12, %s1474_s28 }
 0x163   :  { %v207_v14 = vpop.f32.mrf.mxu1 }
 0x164   :  { %v223_v15 = vmul.f32 2.0, %v207_v14 }
 0x166   :  { %v270_v19 = vsub.f32 %v223_v15, %v246_v62 }
 0x168   :  { %v1399_v20 = vpack.i.bf16 %v270_v19, %v269_v18  ;;  %v304_v19 = vld.sshfl [vmem:[#allocation1 + $0x20] sm:$0xff pattern:$0x75316420] }
 0x16a   :  { %1400 = vrot.lane.b32.xlu1 %v1399_v20, %s1475_s17  ;;  %v305_v20 = vld.sshfl [vmem:[#allocation1 + $0x30] sm:$0xff pattern:$0x75316420] }
 0x16b   :  { %v210_v22 = vpop.f32.mrf.mxu1 }
 0x16c   :  { %v224_v17 = vmul.f32 2.0, %v210_v22 }
 0x16e   :  { %v271_v28 = vsub.f32 %v224_v17, %v1604_v46  ;;  %v380_v46 = vsel %vm378_vm3, %v1616_v59, %v1388_v40  ;;  %v382_v59 = vsel %vm378_vm3, %v1632_v3, %v1398_v52  ;;  %v1408_v3 = vunpack.i.h.bf16 %v1406_v58 }
 0x170   :  { %v384_v9 = vsel %vm378_vm3, %v303_v6, %v1408_v3 }
 0x173   :  { %v212_v26 = vpop.f32.mrf.mxu1 }
 0x174   :  { %v225_v27 = vmul.f32 2.0, %v212_v26 }
 0x176   :  { %v272_v29 = vsub.f32 %v225_v27, %v1608_v48 }
 0x178   :  { %v1409_v30 = vpack.i.bf16 %v272_v29, %v271_v28  ;;  %v924_v28 = vld [vmem:[%s2029_s5 + $0x20] sm:$0xf] }
 0x179   :  { %v946_v29 = vunpack.c.l.b16 %v924_v28 }
 0x17a   :  { %1410 = vrot.lane.b32.xlu2 %v1409_v30, %s1475_s17 }
 0x17b   :  { %v215_v31 = vpop.f32.mrf.mxu1  ;;  %v951_v30 = vpack.c.b16 %v946_v29, %v946_v29 }
 0x17c   :  { %v226_v32 = vmul.f32 2.0, %v215_v31 }
 0x17d   :  { %v970_v31 = vsel %vm424_vm2, %v951_v30, 0  ;;  %v707_v30 = vld [vmem:[%s2030_s3 + $0x10] sm:$0xff] }
 0x17e   :  { %v273_v35 = vsub.f32 %v226_v32, %v257_v63  ;;  %v1694_v32 = vld [vmem:[%s2028_s6] sm:$0xff] }
 0x183   :  { %v217_v33 = vpop.f32.mrf.mxu1 }
 0x184   :  { %v227_v34 = vmul.f32 2.0, %v217_v33 }
 0x186   :  { %v274_v36 = vsub.f32 %v227_v34, %v258_v0  ;;  %v1671_v0 = vld [vmem:[%s2028_s6 + $0x8] sm:$0xff] }
 0x187   :  { %497 = vmatpush.msrb.mxu1 %v1671_v0  ;;  %1375 = vmatpush.msra.mxu3 %v1671_v0 }
 0x188   :  { %v1419_v37 = vpack.i.bf16 %v274_v36, %v273_v35  ;;  %607 = vmatpush.msrb.mxu0 %v1671_v0  ;;  %1377 = vmatpush.msrb.mxu2 %v1671_v0 }
 0x189   :  { %498 = vmatpush.msrb.mxu1 %v1694_v32  ;;  %1376 = vmatpush.msra.mxu3 %v1694_v32 }
 0x18a   :  { %1420 = vrot.lane.b32.xlu1 %v1419_v37, %s1475_s17  ;;  %608 = vmatpush.msrb.mxu0 %v1694_v32 }
 0x18b   :  { %1378 = vmatpush.msrb.mxu2 %v1694_v32  ;;  %975 = vmatpush.bf16.msra.mxu1 %v970_v31  ;;  %v708_v31 = vld [vmem:[%s2030_s3 + $0x18] sm:$0xff] }
 0x18c   :  { %1041 = vmatpush.msra.mxu0 %v1671_v0 }
 0x18e   :  { %1042 = vmatpush.msra.mxu0 %v1694_v32 }
 0x1cc   :  { %v1391_v43 = vpop.permute.xlu0 %1390 }
 0x1cd   :  { %v1393_v44 = vunpack.i.h.bf16 %v1391_v43  ;;  %v1392_v45 = vunpack.i.l.bf16 %v1391_v43 }
 0x1cf   :  { %v387_v48 = vsel %vm112_vm0, %v379_v47, %v1392_v45  ;;  %v388_v49 = vsel %vm112_vm0, %v380_v46, %v1393_v44 }
 0x1d0   :  { %v398_v50 = vpack.c.bf16 %v388_v49, %v387_v48  ;;  %v1476_v49 = vmov 64.0  }
 0x1d1   :  { %1468 = vrcp.f32 %v1476_v49 }
 0x1d2   :  { %1298 = vmatmul.msk.bf16.vlgmr.msra.gmra.mxu2 %vm411_vm4, %v398_v50 }
 0x1d4   :  { %v1411_v1 = vpop.permute.xlu2 %1410  ;;  %v1416_v14 = vpop.permute.xlu0 %1415 }
 0x1d5   :  { %v1413_v7 = vunpack.i.h.bf16 %v1411_v1  ;;  %v1412_v8 = vunpack.i.l.bf16 %v1411_v1  ;;  %v1418_v15 = vunpack.i.h.bf16 %v1416_v14  ;;  %v1417_v18 = vunpack.i.l.bf16 %v1416_v14 }
 0x1d7   :  { %v391_v11 = vsel %vm112_vm0, %v383_v10, %v1412_v8  ;;  %v392_v12 = vsel %vm112_vm0, %v384_v9, %v1413_v7  ;;  %v386_v24 = vsel %vm378_vm3, %v305_v20, %v1418_v15  ;;  %v385_v16 = vsel %vm378_vm3, %v304_v19, %v1417_v18  ;;  %v1469_v58 = vpop.eup %1468 }
 0x1d8   :  { %v400_v13 = vpack.c.bf16 %v392_v12, %v391_v11  ;;  %vm550_vm5 = vweird.f32 %v1469_v58 }
 0x1dc   :  { %v1401_v54 = vpop.permute.xlu1 %1400 }
 0x1dd   :  { %v1403_v55 = vunpack.i.h.bf16 %v1401_v54  ;;  %v1402_v56 = vunpack.i.l.bf16 %v1401_v54 }
 0x1df   :  { %v389_v60 = vsel %vm112_vm0, %v381_v57, %v1402_v56  ;;  %v390_v62 = vsel %vm112_vm0, %v382_v59, %v1403_v55 }
 0x1e0   :  { %v399_v63 = vpack.c.bf16 %v390_v62, %v389_v60 }
 0x1e2   :  { %1299 = vmatmul.msk.bf16.gmra.mxu2 %vm411_vm4, %v399_v63  ;;  %v546_v63 = vmul.f32 64.0, %v1469_v58 }
 0x1e4   :  { %v547_v6 = vsub.f32 1.0, %v546_v63 }
 0x1e6   :  { %v548_v9 = vmul.f32 %v1469_v58, %v547_v6 }
 0x1e8   :  { %v549_v12 = vadd.f32 %v1469_v58, %v548_v9 }
 0x1ea   :  { %v1733_v15 = vsel %vm550_vm5, %v1469_v58, %v549_v12 }
 0x1f2   :  { %1300 = vmatmul.msk.bf16.gmra.mxu2 %vm411_vm4, %v400_v13 }
 0x1fc   :  { %v1421_v21 = vpop.permute.xlu1 %1420 }
 0x1fd   :  { %v1423_v22 = vunpack.i.h.bf16 %v1421_v21  ;;  %v1422_v23 = vunpack.i.l.bf16 %v1421_v21 }
 0x1ff   :  { %v393_v17 = vsel %vm112_vm0, %v385_v16, %v1422_v23  ;;  %v394_v26 = vsel %vm112_vm0, %v386_v24, %v1423_v22  ;;  %v712_v24 = vld [vmem:[%s2030_s3 + $0x38] sm:$0xff]  ;;  %v709_v16 = vld [vmem:[%s2030_s3 + $0x20] sm:$0xff] }
 0x200   :  { %v401_v27 = vpack.c.bf16 %v394_v26, %v393_v17  ;;  %735 = vrot.lane.b32.xlu0 %v712_v24, %s1475_s17  ;;  %729 = vrot.lane.b32.xlu1 %v709_v16, %s1475_s17 }
 0x202   :  { %1301 = vmatmul.msk.bf16.gmra.mxu2 %vm411_vm4, %v401_v27  ;;  %v711_v27 = vld [vmem:[%s2030_s3 + $0x30] sm:$0xff] }
 0x203   :  { %733 = vrot.lane.b32.xlu2 %v711_v27, %s1475_s17 }
 0x208   :  { %725 = vrot.lane.b32.xlu0 %v707_v30, %s1475_s17  ;;  %727 = vrot.lane.b32.xlu1 %v708_v31, %s1475_s17  ;;  %v1465_v31 = vld [vmem:[%s2032_s8] ss:$0 sm:$0xff]  ;;  %s1478_s8 = smov 48  }
 0x255   :  { %v437_v33 = vpop.f32.mrf.mxu2 }
 0x256   :  { %1302 = vmatmul.msk.f32.vlgmr.msrb.gmra.mxu1 %vm112_vm0, %v437_v33 }
 0x25d   :  { %v1703_v34 = vpop.f32.mrf.mxu2  ;;  %v734_v27 = vpop.permute.xlu2 %733 }
 0x25e   :  { %1303 = vmatmul.msk.f32.gmra.mxu1 %vm112_vm0, %v1703_v34 }
 0x265   :  { %v1707_v35 = vpop.f32.mrf.mxu2 }
 0x266   :  { %1304 = vmatmul.msk.f32.gmra.mxu1 %vm112_vm0, %v1707_v35 }
 0x26d   :  { %v1711_v36 = vpop.f32.mrf.mxu2 }
 0x26e   :  { %1305 = vmatmul.msk.f32.vlgmr.msra.gmra.mxu3 %vm112_vm0, %v1711_v36 }
 0x272   :  { %v736_v16 = vpop.permute.xlu0 %735 }
 0x275   :  { %v1715_v37 = vpop.f32.mrf.mxu2 }
 0x276   :  { %1306 = vmatmul.msk.f32.gmra.mxu3 %vm112_vm0, %v1715_v37 }
 0x27d   :  { %v449_v38 = vpop.f32.mrf.mxu2 }
 0x27e   :  { %1307 = vmatmul.msk.f32.gmra.mxu3 %vm112_vm0, %v449_v38 }
 0x285   :  { %v452_v39 = vpop.f32.mrf.mxu2 }
 0x286   :  { %1308 = vmatmul.msk.f32.gmra.mxu3 %vm112_vm0, %v452_v39 }
 0x28d   :  { %v1721_v40 = vpop.f32.mrf.mxu2 }
 0x28e   :  { %1309 = vmatmul.msk.f32.gmra.mxu3 %vm112_vm0, %v1721_v40 }
 0x2d3   :  { %v500_v42 = vpop.f32.mrf.mxu1 }
 0x2d4   :  { %v524_v50 = vsel %vm112_vm0, %v500_v42, 0.0 }
 0x2db   :  { %v503_v44 = vpop.f32.mrf.mxu1 }
 0x2dc   :  { %v525_v48 = vsel %vm112_vm0, %v503_v44, 0.0 }
 0x2dd   :  { %v526_v52 = vadd.f32 %v525_v48, %v524_v50 }
 0x2e3   :  { %v506_v47 = vpop.f32.mrf.mxu1 }
 0x2e4   :  { %v527_v51 = vsel %vm112_vm0, %v506_v47, 0.0 }
 0x2e5   :  { %v528_v54 = vadd.f32 %v527_v51, %v526_v52 }
 0x2f1   :  { %v509_v43 = vpop.f32.mrf.mxu3 }
 0x2f2   :  { %v529_v53 = vsel %vm112_vm0, %v509_v43, 0.0  ;;  %v706_v43 = vld [vmem:[%s2030_s3 + $0x8] sm:$0xff] }
 0x2f3   :  { %v530_v59 = vadd.f32 %v529_v53, %v528_v54  ;;  %723 = vrot.lane.b32.xlu0 %v706_v43, %s1475_s17 }
 0x2f9   :  { %v512_v45 = vpop.f32.mrf.mxu3 }
 0x2fa   :  { %v531_v56 = vsel %vm112_vm0, %v512_v45, 0.0 }
 0x2fb   :  { %v532_v60 = vadd.f32 %v531_v56, %v530_v59 }
 0x301   :  { %v515_v46 = vpop.f32.mrf.mxu3 }
 0x302   :  { %v533_v57 = vsel %vm112_vm0, %v515_v46, 0.0 }
 0x303   :  { %v534_v1 = vadd.f32 %v533_v57, %v532_v60 }
 0x309   :  { %v518_v55 = vpop.f32.mrf.mxu3 }
 0x30a   :  { %v535_v62 = vsel %vm112_vm0, %v518_v55, 0.0 }
 0x30b   :  { %v536_v3 = vadd.f32 %v535_v62, %v534_v1 }
 0x311   :  { %v521_v4 = vpop.f32.mrf.mxu3 }
 0x312   :  { %v537_v5 = vsel %vm112_vm0, %v521_v4, 0.0 }
 0x313   :  { %v538_v7 = vadd.f32 %v537_v5, %v536_v3 }
 0x315   :  { %v539_v8 = vrot.slane %v538_v7, 4 }
 0x317   :  { %v540_v10 = vadd.f32 %v539_v8, %v538_v7 }
 0x319   :  { %v541_v11 = vrot.slane %v540_v10, 2 }
 0x31b   :  { %v542_v13 = vadd.f32 %v541_v11, %v540_v10 }
 0x31d   :  { %v543_v14 = vrot.slane %v542_v13, 1 }
 0x31f   :  { %v544_v18 = vadd.f32 %v543_v14, %v542_v13 }
 0x321   :  { %v552_v19 = vmul.f32 %v1733_v15, %v544_v18 }
 0x323   :  { %v1736_v20 = vsub.f32 %v437_v33, %v552_v19  ;;  %v1738_v21 = vsub.f32 %v449_v38, %v552_v19  ;;  %v1755_v17 = vsub.f32 %v1703_v34, %v552_v19  ;;  %v1757_v26 = vsub.f32 %v452_v39, %v552_v19  ;;  %v710_v33 = vld [vmem:[%s2030_s3 + $0x28] sm:$0xff] }
 0x324   :  { %v1781_v34 = vsub.f32 %v1707_v35, %v552_v19  ;;  %v1784_v38 = vsub.f32 %v1721_v40, %v552_v19  ;;  %731 = vrot.lane.b32.xlu2 %v710_v33, %s1475_s17  ;;  %v705_v35 = vld [vmem:[%s2030_s3] sm:$0xff]  ;;  %v556_v40 = vsub.f32 %v1711_v36, %v552_v19  ;;  %v557_v45 = vsub.f32 %v1715_v37, %v552_v19 }
 0x325   :  { %v561_v22 = vmul.f32 %v1736_v20, %v1736_v20  ;;  %v566_v23 = vmul.f32 %v1738_v21, %v1738_v21  ;;  %v562_v28 = vmul.f32 %v1755_v17, %v1755_v17  ;;  %v567_v29 = vmul.f32 %v1757_v26, %v1757_v26 }
 0x326   :  { %v563_v39 = vmul.f32 %v1781_v34, %v1781_v34  ;;  %v568_v42 = vmul.f32 %v1784_v38, %v1784_v38  ;;  %v564_v44 = vmul.f32 %v556_v40, %v556_v40  ;;  %v565_v46 = vmul.f32 %v557_v45, %v557_v45 }
 0x327   :  { %1310 = vmatmul.msk.f32.vlgmr.msrb.gmra.mxu0 %vm112_vm0, %v561_v22  ;;  %1315 = vmatmul.msk.f32.vlgmr.msrb.gmra.mxu2 %vm112_vm0, %v566_v23 }
 0x32c   :  { %721 = vrot.lane.b32.xlu2 %v705_v35, %s1475_s17 }
 0x32f   :  { %1311 = vmatmul.msk.f32.gmra.mxu0 %vm112_vm0, %v562_v28  ;;  %1316 = vmatmul.msk.f32.gmra.mxu2 %vm112_vm0, %v567_v29  ;;  %v1464_v29 = vld [vmem:[%s2031_s7] ss:$0 sm:$0xff]  ;;  %s1477_s7 = smov 24  }
 0x337   :  { %1312 = vmatmul.msk.f32.gmra.mxu0 %vm112_vm0, %v563_v39  ;;  %1317 = vmatmul.msk.f32.gmra.mxu2 %vm112_vm0, %v568_v42 }
 0x33f   :  { %1313 = vmatmul.msk.f32.gmra.mxu0 %vm112_vm0, %v564_v44 }
 0x347   :  { %1314 = vmatmul.msk.f32.gmra.mxu0 %vm112_vm0, %v565_v46 }
 0x3a4   :  { %v610_v47 = vpop.f32.mrf.mxu0 }
 0x3a5   :  { %v634_v36 = vsel %vm112_vm0, %v610_v47, 0.0 }
 0x3aa   :  { %v625_v49 = vpop.f32.mrf.mxu2 }
 0x3ab   :  { %v643_v62 = vsel %vm112_vm0, %v625_v49, 0.0 }
 0x3ac   :  { %v613_v48 = vpop.f32.mrf.mxu0 }
 0x3ad   :  { %v635_v52 = vsel %vm112_vm0, %v613_v48, 0.0 }
 0x3ae   :  { %v636_v55 = vadd.f32 %v635_v52, %v634_v36 }
 0x3b2   :  { %v628_v53 = vpop.f32.mrf.mxu2 }
 0x3b3   :  { %v645_v3 = vsel %vm112_vm0, %v628_v53, 0.0 }
 0x3b4   :  { %v616_v50 = vpop.f32.mrf.mxu0 }
 0x3b5   :  { %v637_v54 = vsel %vm112_vm0, %v616_v50, 0.0  ;;  %v730_v50 = vpop.permute.xlu1 %729 }
 0x3b6   :  { %v638_v58 = vadd.f32 %v637_v54, %v636_v55 }
 0x3ba   :  { %v631_v63 = vpop.f32.mrf.mxu2 }
 0x3bb   :  { %v647_v5 = vsel %vm112_vm0, %v631_v63, 0.0 }
 0x3bc   :  { %v619_v51 = vpop.f32.mrf.mxu0 }
 0x3bd   :  { %v639_v56 = vsel %vm112_vm0, %v619_v51, 0.0 }
 0x3be   :  { %v640_v37 = vadd.f32 %v639_v56, %v638_v58 }
 0x3c4   :  { %v622_v59 = vpop.f32.mrf.mxu0 }
 0x3c5   :  { %v641_v57 = vsel %vm112_vm0, %v622_v59, 0.0 }
 0x3c6   :  { %v642_v60 = vadd.f32 %v641_v57, %v640_v37 }
 0x3c8   :  { %v644_v1 = vadd.f32 %v643_v62, %v642_v60 }
 0x3ca   :  { %v646_v4 = vadd.f32 %v645_v3, %v644_v1 }
 0x3cc   :  { %v648_v6 = vadd.f32 %v647_v5, %v646_v4 }
 0x3ce   :  { %v649_v7 = vrot.slane %v648_v6, 4 }
 0x3d0   :  { %v650_v8 = vadd.f32 %v649_v7, %v648_v6  ;;  %v728_v7 = vpop.permute.xlu1 %727 }
 0x3d2   :  { %v651_v9 = vrot.slane %v650_v8, 2 }
 0x3d4   :  { %v652_v10 = vadd.f32 %v651_v9, %v650_v8 }
 0x3d6   :  { %v653_v11 = vrot.slane %v652_v10, 1 }
 0x3d8   :  { %v654_v12 = vadd.f32 %v653_v11, %v652_v10 }
 0x3da   :  { %v655_v13 = vmul.f32 %v654_v12, %v1733_v15 }
 0x3dc   :  { %v656_v14 = vadd.f32 1e-05, %v655_v13 }
 0x3de   :  { %1470 = vrsqrt.f32 %v656_v14  ;;  %vm663_vm7 = vweird.f32 %v656_v14 }
 0x3e4   :  { %v1471_v18 = vpop.eup %1470 }
 0x3e5   :  { %v658_v19 = vmul.f32 %v1471_v18, %v656_v14  ;;  %vm664_vm6 = vweird.f32 %v1471_v18 }
 0x3e6   :  { %vm665_vm8 = vmor %vm663_vm7, %vm664_vm6 }
 0x3e7   :  { %v659_v22 = vmul.f32 %v1471_v18, %v658_v19 }
 0x3e9   :  { %v660_v23 = vmul.f32 0.5, %v659_v22 }
 0x3eb   :  { %v661_v24 = vsub.f32 1.5, %v660_v23 }
 0x3ed   :  { %v662_v28 = vmul.f32 %v1471_v18, %v661_v24 }
 0x3ef   :  { %v666_v30 = vsel %vm665_vm8, %v1471_v18, %v662_v28 }
 0x3f0   :  { %v674_v33 = vmul.f32 %v666_v30, %v1784_v38  ;;  %v673_v39 = vmul.f32 %v666_v30, %v1757_v26  ;;  %v669_v42 = vmul.f32 %v666_v30, %v1781_v34  ;;  %v672_v43 = vmul.f32 %v666_v30, %v1738_v21  ;;  %v726_v21 = vpop.permute.xlu0 %725 }
 0x3f1   :  { %v671_v35 = vmul.f32 %v666_v30, %v557_v45  ;;  %v668_v44 = vmul.f32 %v666_v30, %v1755_v17  ;;  %v670_v46 = vmul.f32 %v666_v30, %v556_v40  ;;  %v667_v51 = vmul.f32 %v666_v30, %v1736_v20  ;;  %v732_v45 = vpop.permute.xlu2 %731 }
 0x3f2   :  { %v685_v47 = vmul.f32 %v1464_v29, %v674_v33  ;;  %v684_v48 = vmul.f32 %v1464_v29, %v673_v39  ;;  %v683_v49 = vmul.f32 %v1464_v29, %v672_v43  ;;  %v680_v52 = vmul.f32 %v1464_v29, %v669_v42 }
 0x3f3   :  { %v682_v53 = vmul.f32 %v1464_v29, %v671_v35  ;;  %v681_v36 = vmul.f32 %v1464_v29, %v670_v46  ;;  %v679_v58 = vmul.f32 %v1464_v29, %v668_v44  ;;  %v678_v17 = vmul.f32 %v1464_v29, %v667_v51 }
 0x3f4   :  { %v696_v38 = vadd.f32 %v1465_v31, %v685_v47  ;;  %v695_v54 = vadd.f32 %v1465_v31, %v684_v48  ;;  %v694_v26 = vadd.f32 %v1465_v31, %v683_v49  ;;  %v691_v40 = vadd.f32 %v1465_v31, %v680_v52 }
 0x3f5   :  { %v693_v55 = vadd.f32 %v1465_v31, %v682_v53  ;;  %v692_v57 = vadd.f32 %v1465_v31, %v681_v36  ;;  %v690_v62 = vadd.f32 %v1465_v31, %v679_v58  ;;  %v689_v63 = vadd.f32 %v1465_v31, %v678_v17 }
 0x3f6   :  { %v704_v34 = vmax.f32 %v696_v38, 0.0  ;;  %v703_v56 = vmax.f32 %v695_v54, 0.0  ;;  %v702_v37 = vmax.f32 %v694_v26, 0.0  ;;  %v699_v3 = vmax.f32 %v691_v40, 0.0  ;;  %v1374_v54 = vld [vmem:[%s2029_s5 + $0x18] sm:$0xff] }
 0x3f7   :  { %v701_v59 = vmax.f32 %v693_v55, 0.0  ;;  %v700_v6 = vmax.f32 %v692_v57, 0.0  ;;  %v698_v10 = vmax.f32 %v690_v62, 0.0  ;;  %v697_v11 = vmax.f32 %v689_v63, 0.0  ;;  %976 = vmatpush.bf16.msra.mxu1 %v1374_v54  ;;  %v1373_v55 = vld [vmem:[%s2029_s5 + $0x10] sm:$0xff] }
 0x3f8   :  { %v1827_v60 = vsel %vm112_vm0, %v704_v34, %v736_v16  ;;  %v1830_v20 = vsel %vm112_vm0, %v703_v56, %v734_v27  ;;  %v1835_v4 = vsel %vm112_vm0, %v702_v37, %v732_v45  ;;  %v1843_v9 = vsel %vm112_vm0, %v699_v3, %v726_v21  ;;  %v724_v13 = vpop.permute.xlu0 %723  ;;  %v1372_v56 = vld [vmem:[%s2029_s5 + $0x8] sm:$0xff] }
 0x3f9   :  { %v756_v1 = vpack.c.bf16 %v1827_v60, %v1830_v20  ;;  %v1838_v5 = vsel %vm112_vm0, %v701_v59, %v730_v50  ;;  %v1846_v12 = vsel %vm112_vm0, %v700_v6, %v728_v7  ;;  %v722_v14 = vpop.permute.xlu2 %721  ;;  %v1851_v19 = vsel %vm112_vm0, %v698_v10, %v724_v13  ;;  %v1371_v7 = vld [vmem:[%s2029_s5] sm:$0xff] }
 0x3fa   :  { %v755_v8 = vpack.c.bf16 %v1835_v4, %v1838_v5  ;;  %v754_v18 = vpack.c.bf16 %v1846_v12, %v1843_v9  ;;  %v1854_v22 = vsel %vm112_vm0, %v697_v11, %v722_v14 }
 0x3fb   :  { %761 = vmatpush.bf16.msrb.mxu3 %v756_v1  ;;  %v753_v23 = vpack.c.bf16 %v1851_v19, %v1854_v22  ;;  %977 = vmatpush.bf16.msra.mxu1 %v1373_v55 }
 0x3ff   :  { %762 = vmatpush.bf16.msrb.mxu3 %v755_v8  ;;  %978 = vmatpush.bf16.msra.mxu1 %v1372_v56 }
 0x403   :  { %763 = vmatpush.bf16.msrb.mxu3 %v754_v18  ;;  %979 = vmatpush.bf16.msra.mxu1 %v1371_v7 }
 0x407   :  { %764 = vmatpush.bf16.msrb.mxu3 %v753_v23 }
 0x40a   :  { %1318 = vmatmul.msk.bf16.vlgmr.msrb.gmra.mxu3 %vm178_vm1, %v1582_v25 }
 0x40b   :  { %1144 = vmatpush.msra.mxu3 %v1671_v0 }
 0x40d   :  { %1145 = vmatpush.msra.mxu3 %v1694_v32 }
 0x41a   :  { %1319 = vmatmul.msk.bf16.gmra.mxu3 %vm178_vm1, %v1600_v41 }
 0x42a   :  { %1320 = vmatmul.msk.bf16.gmra.mxu3 %vm178_vm1, %v1621_v61 }
 0x43a   :  { %1321 = vmatmul.msk.bf16.gmra.mxu3 %vm178_vm1, %v1630_v2 }
 0x48d   :  { %v766_v24 = vpop.f32.mrf.mxu3 }
 0x495   :  { %v768_v16 = vpop.f32.mrf.mxu3 }
 0x496   :  { %v1424_v27 = vpack.i.bf16 %v768_v16, %v766_v24  ;;  %v786_v44 = vpack.c.bf16 %v768_v16, %v766_v24 }
 0x498   :  { %1425 = vrot.lane.b32.xlu1 %v1424_v27, %s1477_s7 }
 0x49d   :  { %v771_v0 = vpop.f32.mrf.mxu3 }
 0x4a5   :  { %v773_v28 = vpop.f32.mrf.mxu3 }
 0x4a6   :  { %v1434_v29 = vpack.i.bf16 %v773_v28, %v771_v0  ;;  %v787_v35 = vpack.c.bf16 %v773_v28, %v771_v0 }
 0x4a8   :  { %1435 = vrot.lane.b32.xlu0 %v1434_v29, %s1477_s7 }
 0x4ad   :  { %v776_v32 = vpop.f32.mrf.mxu3 }
 0x4b5   :  { %v778_v30 = vpop.f32.mrf.mxu3 }
 0x4b6   :  { %v1444_v31 = vpack.i.bf16 %v778_v30, %v776_v32  ;;  %v788_v43 = vpack.c.bf16 %v778_v30, %v776_v32 }
 0x4bd   :  { %v781_v33 = vpop.f32.mrf.mxu3 }
 0x4c5   :  { %v783_v39 = vpop.f32.mrf.mxu3 }
 0x4c6   :  { %v789_v42 = vpack.c.bf16 %v783_v39, %v781_v33  ;;  %v1454_v34 = vpack.i.bf16 %v783_v39, %v781_v33 }
 0x4c8   :  { %794 = vmatpush.bf16.msra.mxu2 %v789_v42 }
 0x4cc   :  { %795 = vmatpush.bf16.msra.mxu2 %v788_v43 }
 0x4d0   :  { %796 = vmatpush.bf16.msra.mxu2 %v787_v35 }
 0x4d4   :  { %797 = vmatpush.bf16.msra.mxu2 %v786_v44 }
 0x4d7   :  { %1322 = vmatmul.msk.bf16.vlgmr.msra.gmra.mxu2 %vm178_vm1, %v1582_v25 }
 0x4e7   :  { %1323 = vmatmul.msk.bf16.gmra.mxu2 %vm178_vm1, %v1600_v41 }
 0x4f7   :  { %1324 = vmatmul.msk.bf16.gmra.mxu2 %vm178_vm1, %v1621_v61 }
 0x507   :  { %1325 = vmatmul.msk.bf16.gmra.mxu2 %vm178_vm1, %v1630_v2 }
 0x50a   :  { %v1426_v8 = vpop.permute.xlu1 %1425 }
 0x50b   :  { %v1428_v10 = vunpack.i.h.bf16 %v1426_v8  ;;  %v1427_v11 = vunpack.i.l.bf16 %v1426_v8 }
 0x50d   :  { %v900_v23 = vsel %vm411_vm4, %v1851_v19, %v1428_v10  ;;  %v899_v24 = vsel %vm411_vm4, %v1854_v22, %v1427_v11 }
 0x51a   :  { %v1436_v28 = vpop.permute.xlu0 %1435 }
 0x51b   :  { %v1438_v29 = vunpack.i.h.bf16 %v1436_v28  ;;  %v1437_v32 = vunpack.i.l.bf16 %v1436_v28 }
 0x55a   :  { %v799_v46 = vpop.f32.mrf.mxu2 }
 0x55b   :  { %v819_v47 = vmul.f32 2.0, %v799_v46 }
 0x55d   :  { %v827_v50 = vsub.f32 %v819_v47, %v1854_v22  ;;  %v901_v22 = vsel %vm411_vm4, %v1843_v9, %v1437_v32 }
 0x562   :  { %v801_v48 = vpop.f32.mrf.mxu2 }
 0x563   :  { %v820_v49 = vmul.f32 2.0, %v801_v48 }
 0x565   :  { %v828_v51 = vsub.f32 %v820_v49, %v1851_v19  ;;  %v902_v19 = vsel %vm411_vm4, %v1846_v12, %v1438_v29 }
 0x567   :  { %v1429_v52 = vpack.i.bf16 %v828_v51, %v827_v50 }
 0x569   :  { %1430 = vrot.lane.b32.xlu2 %v1429_v52, %s1478_s8 }
 0x56a   :  { %v804_v25 = vpop.f32.mrf.mxu2 }
 0x56b   :  { %v821_v41 = vmul.f32 2.0, %v804_v25 }
 0x56d   :  { %v829_v2 = vsub.f32 %v821_v41, %v1843_v9 }
 0x571   :  { %1445 = vrot.lane.b32.xlu2 %v1444_v31, %s1477_s7 }
 0x572   :  { %v806_v61 = vpop.f32.mrf.mxu2 }
 0x573   :  { %v822_v53 = vmul.f32 2.0, %v806_v61 }
 0x575   :  { %v830_v36 = vsub.f32 %v822_v53, %v1846_v12 }
 0x577   :  { %v1439_v38 = vpack.i.bf16 %v830_v36, %v829_v2 }
 0x579   :  { %1440 = vrot.lane.b32.xlu1 %v1439_v38, %s1478_s8 }
 0x57a   :  { %v809_v26 = vpop.f32.mrf.mxu2 }
 0x57b   :  { %v823_v21 = vmul.f32 2.0, %v809_v26 }
 0x57d   :  { %v831_v17 = vsub.f32 %v823_v21, %v1838_v5 }
 0x581   :  { %1455 = vrot.lane.b32.xlu1 %v1454_v34, %s1477_s7 }
 0x582   :  { %v811_v45 = vpop.f32.mrf.mxu2 }
 0x583   :  { %v824_v58 = vmul.f32 2.0, %v811_v45 }
 0x585   :  { %v832_v40 = vsub.f32 %v824_v58, %v1835_v4 }
 0x587   :  { %v1449_v37 = vpack.i.bf16 %v832_v40, %v831_v17 }
 0x589   :  { %1450 = vrot.lane.b32.xlu0 %v1449_v37, %s1478_s8 }
 0x58a   :  { %v814_v59 = vpop.f32.mrf.mxu2 }
 0x58b   :  { %v825_v57 = vmul.f32 2.0, %v814_v59 }
 0x58d   :  { %v833_v1 = vsub.f32 %v825_v57, %v1830_v20 }
 0x592   :  { %v816_v62 = vpop.f32.mrf.mxu2 }
 0x593   :  { %v826_v63 = vmul.f32 2.0, %v816_v62 }
 0x595   :  { %v834_v3 = vsub.f32 %v826_v63, %v1827_v60 }
 0x597   :  { %v1459_v6 = vpack.i.bf16 %v834_v3, %v833_v1 }
 0x599   :  { %1460 = vrot.lane.b32.xlu2 %v1459_v6, %s1478_s8 }
 0x5c3   :  { %v1431_v13 = vpop.permute.xlu2 %1430 }
 0x5c4   :  { %v1433_v14 = vunpack.i.h.bf16 %v1431_v13  ;;  %v1432_v18 = vunpack.i.l.bf16 %v1431_v13 }
 0x5c6   :  { %v909_v16 = vsel %vm907_vm9, %v900_v23, %v1433_v14  ;;  %v908_v27 = vsel %vm907_vm9, %v899_v24, %v1432_v18 }
 0x5c7   :  { %v925_v0 = vpack.c.bf16 %v909_v16, %v908_v27 }
 0x5c9   :  { %1342 = vmatmul.msk.bf16.vlgmr.msra.gmra.mxu1 %vm956_vm10, %v925_v0 }
 0x5cb   :  { %v1446_v35 = vpop.permute.xlu2 %1445 }
 0x5cc   :  { %v1448_v44 = vunpack.i.h.bf16 %v1446_v35  ;;  %v1447_v46 = vunpack.i.l.bf16 %v1446_v35 }
 0x5ce   :  { %v904_v50 = vsel %vm411_vm4, %v1835_v4, %v1448_v44  ;;  %v903_v12 = vsel %vm411_vm4, %v1838_v5, %v1447_v46 }
 0x5eb   :  { %v1441_v30 = vpop.permute.xlu1 %1440 }
 0x5ec   :  { %v1443_v31 = vunpack.i.h.bf16 %v1441_v30  ;;  %v1442_v33 = vunpack.i.l.bf16 %v1441_v30 }
 0x5ee   :  { %v910_v39 = vsel %vm907_vm9, %v901_v22, %v1442_v33  ;;  %v911_v42 = vsel %vm907_vm9, %v902_v19, %v1443_v31 }
 0x5ef   :  { %v926_v43 = vpack.c.bf16 %v911_v42, %v910_v39 }
 0x5f1   :  { %1343 = vmatmul.msk.bf16.gmra.mxu1 %vm956_vm10, %v926_v43 }
 0x5f3   :  { %v1456_v25 = vpop.permute.xlu1 %1455  ;;  %v1461_v53 = vpop.permute.xlu2 %1460 }
 0x5f4   :  { %v1458_v41 = vunpack.i.h.bf16 %v1456_v25  ;;  %v1457_v61 = vunpack.i.l.bf16 %v1456_v25  ;;  %v1463_v2 = vunpack.i.h.bf16 %v1461_v53  ;;  %v1462_v36 = vunpack.i.l.bf16 %v1461_v53 }
 0x5f6   :  { %v906_v38 = vsel %vm411_vm4, %v1827_v60, %v1458_v41  ;;  %v905_v4 = vsel %vm411_vm4, %v1830_v20, %v1457_v61 }
 0x5f7   :  { %v914_v5 = vsel %vm907_vm9, %v905_v4, %v1462_v36  ;;  %v915_v54 = vsel %vm907_vm9, %v906_v38, %v1463_v2 }
 0x5f8   :  { %v928_v26 = vpack.c.bf16 %v915_v54, %v914_v5 }
 0x5fb   :  { %v1451_v47 = vpop.permute.xlu0 %1450 }
 0x5fc   :  { %v1453_v48 = vunpack.i.h.bf16 %v1451_v47  ;;  %v1452_v49 = vunpack.i.l.bf16 %v1451_v47 }
 0x5fe   :  { %v912_v9 = vsel %vm907_vm9, %v903_v12, %v1452_v49  ;;  %v913_v51 = vsel %vm907_vm9, %v904_v50, %v1453_v48 }
 0x5ff   :  { %v927_v52 = vpack.c.bf16 %v913_v51, %v912_v9 }
 0x601   :  { %1344 = vmatmul.msk.bf16.gmra.mxu1 %vm956_vm10, %v927_v52 }
 0x611   :  { %1345 = vmatmul.msk.bf16.gmra.mxu1 %vm956_vm10, %v928_v26 }
 0x646   :  { %v981_v55 = vpop.f32.mrf.mxu1 }
 0x647   :  { %1346 = vmatmul.msk.f32.vlgmr.msra.gmra.mxu0 %vm112_vm0, %v981_v55 }
 0x64e   :  { %v983_v34 = vpop.f32.mrf.mxu1 }
 0x64f   :  { %1347 = vmatmul.msk.f32.gmra.mxu0 %vm112_vm0, %v983_v34 }
 0x66e   :  { %v986_v56 = vpop.f32.mrf.mxu1 }
 0x66f   :  { %1348 = vmatmul.msk.f32.gmra.mxu0 %vm112_vm0, %v986_v56 }
 0x676   :  { %v988_v60 = vpop.f32.mrf.mxu1 }
 0x677   :  { %1349 = vmatmul.msk.f32.gmra.mxu0 %vm112_vm0, %v988_v60 }
 0x67e   :  { %v991_v20 = vpop.f32.mrf.mxu1 }
 0x67f   :  { %1350 = vmatmul.msk.f32.gmra.mxu0 %vm112_vm0, %v991_v20 }
 0x686   :  { %v993_v21 = vpop.f32.mrf.mxu1 }
 0x687   :  { %1351 = vmatmul.msk.f32.gmra.mxu0 %vm112_vm0, %v993_v21 }
 0x68e   :  { %v996_v45 = vpop.f32.mrf.mxu1 }
 0x68f   :  { %1352 = vmatmul.msk.f32.gmra.mxu0 %vm112_vm0, %v996_v45 }
 0x696   :  { %v998_v58 = vpop.f32.mrf.mxu1 }
 0x697   :  { %1353 = vmatmul.msk.f32.gmra.mxu0 %vm112_vm0, %v998_v58 }
 0x6c4   :  { %v1044_v17 = vpop.f32.mrf.mxu0 }
 0x6c5   :  { %v1068_v1 = vsel %vm112_vm0, %v1044_v17, 0.0 }
 0x6cc   :  { %v1047_v40 = vpop.f32.mrf.mxu0 }
 0x6cd   :  { %v1069_v63 = vsel %vm112_vm0, %v1047_v40, 0.0 }
 0x6ce   :  { %v1070_v6 = vadd.f32 %v1069_v63, %v1068_v1 }
 0x6ec   :  { %v1050_v37 = vpop.f32.mrf.mxu0 }
 0x6ed   :  { %v1071_v3 = vsel %vm112_vm0, %v1050_v37, 0.0 }
 0x6ee   :  { %v1072_v8 = vadd.f32 %v1071_v3, %v1070_v6 }
 0x6f4   :  { %v1053_v59 = vpop.f32.mrf.mxu0 }
 0x6f5   :  { %v1073_v7 = vsel %vm112_vm0, %v1053_v59, 0.0 }
 0x6f6   :  { %v1074_v13 = vadd.f32 %v1073_v7, %v1072_v8 }
 0x6fc   :  { %v1056_v57 = vpop.f32.mrf.mxu0 }
 0x6fd   :  { %v1075_v11 = vsel %vm112_vm0, %v1056_v57, 0.0 }
 0x6fe   :  { %v1076_v18 = vadd.f32 %v1075_v11, %v1074_v13 }
 0x704   :  { %v1059_v62 = vpop.f32.mrf.mxu0 }
 0x705   :  { %v1077_v14 = vsel %vm112_vm0, %v1059_v62, 0.0 }
 0x706   :  { %v1078_v24 = vadd.f32 %v1077_v14, %v1076_v18 }
 0x70c   :  { %v1062_v10 = vpop.f32.mrf.mxu0 }
 0x70d   :  { %v1079_v23 = vsel %vm112_vm0, %v1062_v10, 0.0 }
 0x70e   :  { %v1080_v16 = vadd.f32 %v1079_v23, %v1078_v24 }
 0x714   :  { %v1065_v27 = vpop.f32.mrf.mxu0 }
 0x715   :  { %v1081_v0 = vsel %vm112_vm0, %v1065_v27, 0.0  ;;  %v1466_v27 = vld [vmem:[%s2033_s9] ss:$0 sm:$0xff] }
 0x716   :  { %v1082_v28 = vadd.f32 %v1081_v0, %v1080_v16 }
 0x718   :  { %v1083_v29 = vrot.slane %v1082_v28, 4 }
 0x71a   :  { %v1084_v32 = vadd.f32 %v1083_v29, %v1082_v28 }
 0x71c   :  { %v1085_v30 = vrot.slane %v1084_v32, 2 }
 0x71e   :  { %v1086_v31 = vadd.f32 %v1085_v30, %v1084_v32  ;;  %v1467_v30 = vld [vmem:[%s2034_s10] ss:$0 sm:$0xff] }
 0x720   :  { %v1087_v33 = vrot.slane %v1086_v31, 1 }
 0x722   :  { %v1088_v19 = vadd.f32 %v1087_v33, %v1086_v31 }
 0x724   :  { %v1089_v22 = vmul.f32 %v1088_v19, %v1733_v15 }
 0x726   :  { %v1949_v39 = vsub.f32 %v981_v55, %v1089_v22  ;;  %v1954_v43 = vsub.f32 %v983_v34, %v1089_v22  ;;  %v1959_v44 = vsub.f32 %v986_v56, %v1089_v22  ;;  %v1964_v47 = vsub.f32 %v988_v60, %v1089_v22 }
 0x727   :  { %v1094_v49 = vsub.f32 %v991_v20, %v1089_v22  ;;  %v1095_v12 = vsub.f32 %v993_v21, %v1089_v22  ;;  %v1096_v51 = vsub.f32 %v996_v45, %v1089_v22  ;;  %v1097_v25 = vsub.f32 %v998_v58, %v1089_v22 }
 0x728   :  { %v1098_v42 = vmul.f32 %v1949_v39, %v1949_v39  ;;  %v1099_v35 = vmul.f32 %v1954_v43, %v1954_v43  ;;  %v1100_v46 = vmul.f32 %v1959_v44, %v1959_v44  ;;  %v1101_v48 = vmul.f32 %v1964_v47, %v1964_v47 }
 0x729   :  { %v1102_v50 = vmul.f32 %v1094_v49, %v1094_v49  ;;  %v1103_v9 = vmul.f32 %v1095_v12, %v1095_v12  ;;  %v1104_v52 = vmul.f32 %v1096_v51, %v1096_v51  ;;  %v1105_v41 = vmul.f32 %v1097_v25, %v1097_v25 }
 0x72a   :  { %1354 = vmatmul.msk.f32.vlgmr.msra.gmra.mxu3 %vm112_vm0, %v1098_v42 }
 0x732   :  { %1355 = vmatmul.msk.f32.gmra.mxu3 %vm112_vm0, %v1099_v35 }
 0x73a   :  { %1356 = vmatmul.msk.f32.gmra.mxu3 %vm112_vm0, %v1100_v46 }
 0x742   :  { %1357 = vmatmul.msk.f32.gmra.mxu3 %vm112_vm0, %v1101_v48 }
 0x74a   :  { %1358 = vmatmul.msk.f32.gmra.mxu3 %vm112_vm0, %v1102_v50 }
 0x752   :  { %1359 = vmatmul.msk.f32.gmra.mxu3 %vm112_vm0, %v1103_v9 }
 0x75a   :  { %1360 = vmatmul.msk.f32.gmra.mxu3 %vm112_vm0, %v1104_v52 }
 0x762   :  { %1361 = vmatmul.msk.f32.gmra.mxu3 %vm112_vm0, %v1105_v41 }
 0x7ad   :  { %v1147_v61 = vpop.f32.mrf.mxu3 }
 0x7ae   :  { %v1171_v54 = vsel %vm112_vm0, %v1147_v61, 0.0 }
 0x7b5   :  { %v1150_v53 = vpop.f32.mrf.mxu3 }
 0x7b6   :  { %v1172_v5 = vsel %vm112_vm0, %v1150_v53, 0.0 }
 0x7b7   :  { %v1173_v55 = vadd.f32 %v1172_v5, %v1171_v54 }
 0x7bd   :  { %v1153_v2 = vpop.f32.mrf.mxu3 }
 0x7be   :  { %v1174_v26 = vsel %vm112_vm0, %v1153_v2, 0.0 }
 0x7bf   :  { %v1175_v56 = vadd.f32 %v1174_v26, %v1173_v55 }
 0x7c5   :  { %v1156_v36 = vpop.f32.mrf.mxu3 }
 0x7c6   :  { %v1176_v34 = vsel %vm112_vm0, %v1156_v36, 0.0 }
 0x7c7   :  { %v1177_v21 = vadd.f32 %v1176_v34, %v1175_v56 }
 0x7cd   :  { %v1159_v38 = vpop.f32.mrf.mxu3 }
 0x7ce   :  { %v1178_v20 = vsel %vm112_vm0, %v1159_v38, 0.0 }
 0x7cf   :  { %v1179_v58 = vadd.f32 %v1178_v20, %v1177_v21 }
 0x7d5   :  { %v1162_v4 = vpop.f32.mrf.mxu3 }
 0x7d6   :  { %v1180_v45 = vsel %vm112_vm0, %v1162_v4, 0.0 }
 0x7d7   :  { %v1181_v40 = vadd.f32 %v1180_v45, %v1179_v58 }
 0x7dd   :  { %v1165_v60 = vpop.f32.mrf.mxu3 }
 0x7de   :  { %v1182_v17 = vsel %vm112_vm0, %v1165_v60, 0.0 }
 0x7df   :  { %v1183_v37 = vadd.f32 %v1182_v17, %v1181_v40 }
 0x7e5   :  { %v1168_v59 = vpop.f32.mrf.mxu3 }
 0x7e6   :  { %v1184_v57 = vsel %vm112_vm0, %v1168_v59, 0.0 }
 0x7e7   :  { %v1185_v62 = vadd.f32 %v1184_v57, %v1183_v37 }
 0x7e9   :  { %v1186_v63 = vrot.slane %v1185_v62, 4 }
 0x7eb   :  { %v1187_v1 = vadd.f32 %v1186_v63, %v1185_v62 }
 0x7ed   :  { %v1188_v3 = vrot.slane %v1187_v1, 2 }
 0x7ef   :  { %v1189_v6 = vadd.f32 %v1188_v3, %v1187_v1 }
 0x7f1   :  { %v1190_v7 = vrot.slane %v1189_v6, 1 }
 0x7f3   :  { %v1191_v8 = vadd.f32 %v1190_v7, %v1189_v6 }
 0x7f5   :  { %v1192_v10 = vmul.f32 %v1191_v8, %v1733_v15 }
 0x7f7   :  { %v1193_v11 = vadd.f32 1e-05, %v1192_v10 }
 0x7f9   :  { %1472 = vrsqrt.f32 %v1193_v11  ;;  %vm1200_vm12 = vweird.f32 %v1193_v11 }
 0x7ff   :  { %v1473_v13 = vpop.eup %1472 }
 0x800   :  { %v1195_v14 = vmul.f32 %v1473_v13, %v1193_v11  ;;  %vm1201_vm11 = vweird.f32 %v1473_v13 }
 0x801   :  { %vm1202_vm13 = vmor %vm1200_vm12, %vm1201_vm11 }
 0x802   :  { %v1196_v18 = vmul.f32 %v1473_v13, %v1195_v14 }
 0x804   :  { %v1197_v23 = vmul.f32 0.5, %v1196_v18 }
 0x806   :  { %v1198_v24 = vsub.f32 1.5, %v1197_v23 }
 0x808   :  { %v1199_v16 = vmul.f32 %v1473_v13, %v1198_v24 }
 0x80a   :  { %v1203_v0 = vsel %vm1202_vm13, %v1473_v13, %v1199_v16 }
 0x80b   :  { %v1204_v28 = vmul.f32 %v1203_v0, %v1949_v39  ;;  %v1205_v15 = vmul.f32 %v1203_v0, %v1954_v43  ;;  %v1206_v29 = vmul.f32 %v1203_v0, %v1959_v44  ;;  %v1207_v32 = vmul.f32 %v1203_v0, %v1964_v47 }
 0x80c   :  { %v1208_v31 = vmul.f32 %v1203_v0, %v1094_v49  ;;  %v1209_v33 = vmul.f32 %v1203_v0, %v1095_v12  ;;  %v1210_v19 = vmul.f32 %v1203_v0, %v1096_v51  ;;  %v1211_v22 = vmul.f32 %v1203_v0, %v1097_v25 }
 0x80d   :  { %v1215_v42 = vmul.f32 %v1466_v27, %v1204_v28  ;;  %v1216_v35 = vmul.f32 %v1466_v27, %v1205_v15  ;;  %v1217_v46 = vmul.f32 %v1466_v27, %v1206_v29  ;;  %v1218_v48 = vmul.f32 %v1466_v27, %v1207_v32 }
 0x80e   :  { %v1219_v50 = vmul.f32 %v1466_v27, %v1208_v31  ;;  %v1220_v39 = vmul.f32 %v1466_v27, %v1209_v33  ;;  %v1221_v9 = vmul.f32 %v1466_v27, %v1210_v19  ;;  %v1222_v43 = vmul.f32 %v1466_v27, %v1211_v22 }
 0x80f   :  { %v1226_v52 = vadd.f32 %v1467_v30, %v1215_v42  ;;  %v1227_v44 = vadd.f32 %v1467_v30, %v1216_v35  ;;  %v1228_v41 = vadd.f32 %v1467_v30, %v1217_v46  ;;  %v1229_v47 = vadd.f32 %v1467_v30, %v1218_v48 }
 0x810   :  { %v1230_v61 = vadd.f32 %v1467_v30, %v1219_v50  ;;  %v1231_v53 = vadd.f32 %v1467_v30, %v1220_v39  ;;  %v1232_v2 = vadd.f32 %v1467_v30, %v1221_v9  ;;  %v1233_v51 = vadd.f32 %v1467_v30, %v1222_v43 }
 0x811   :  { %v1234_v36 = vmax.f32 %v1226_v52, 0.0  ;;  %v1235_v49 = vmax.f32 %v1227_v44, 0.0  ;;  %v1236_v12 = vmax.f32 %v1228_v41, 0.0  ;;  %v1237_v25 = vmax.f32 %v1229_v47, 0.0 }
 0x812   :  { %v1238_v38 = vmax.f32 %v1230_v61, 0.0  ;;  %v1239_v4 = vmax.f32 %v1231_v53, 0.0  ;;  %v1240_v5 = vmax.f32 %v1232_v2, 0.0  ;;  %v1241_v54 = vmax.f32 %v1233_v51, 0.0 }
 0x813   :  { %1242 = vst.msk [vmem:[%s2035_s11] sm:$0xff] %vm112_vm0, %v1234_v36 }
 0x814   :  { %1243 = vst.msk [vmem:[%s2035_s11 + $0x8] sm:$0xff] %vm112_vm0, %v1235_v49 }
 0x815   :  { %1244 = vst.msk [vmem:[%s2035_s11 + $0x10] sm:$0xff] %vm112_vm0, %v1236_v12 }
 0x816   :  { %1245 = vst.msk [vmem:[%s2035_s11 + $0x18] sm:$0xff] %vm112_vm0, %v1237_v25 }
 0x817   :  { %1246 = vst.msk [vmem:[%s2035_s11 + $0x20] sm:$0xff] %vm112_vm0, %v1238_v38 }
 0x818   :  { %1247 = vst.msk [vmem:[%s2035_s11 + $0x28] sm:$0xff] %vm112_vm0, %v1239_v4 }
 0x819   :  { %1248 = vst.msk [vmem:[%s2035_s11 + $0x30] sm:$0xff] %vm112_vm0, %v1240_v5 }
 0x81a   :  { %1249 = vst.msk [vmem:[%s2035_s11 + $0x38] sm:$0xff] %vm112_vm0, %v1241_v54 }

</bundles_post_ra>
